<compile_context>
chip_gen: v7x
topology: tpu7x:2x2x1
jax: 0.10.0
libtpu: 0.0.40
codegen_flags: <defaults>
</compile_context>

<pallas_src>
import jax
import jax.numpy as jnp
from jax.experimental import pallas as pl
from jax.experimental.pallas import tpu as pltpu


def _make_rnn_fc_kernel(num_layers, B, T, D_in, H, O):
    """Stacked tanh-RNN + Linear head, batch_first (B, T, F) layout."""

    def kernel(x_ref, w_ref, b_ref, out_ref, hs_ref):
        # x_ref  : (B, T, D_in)
        # w_ref  : (2L+1, R, C) = [w_ih_0(pad), w_hh_0, ..., w_ih_{L-1}, w_hh_{L-1}, w_fc(pad)]
        # b_ref  : (L+1, 1, C)  = [b_ih_0+b_hh_0, ..., b_fc(pad)]   (folded at init)
        # out_ref: (B, T, O)
        # hs_ref : VMEM scratch (B, T, H) — last layer's hidden states

        # Static per-layer parameter views from the two packed refs.
        w_ih, w_hh, bias = [], [], []
        for l in range(num_layers):
            d_l = D_in if l == 0 else H
            w_ih.append(w_ref[2 * l][:d_l, :H])        # (d_l, H) pre-transposed
            w_hh.append(w_ref[2 * l + 1][:H, :H])      # (H, H)   pre-transposed
            bias.append(b_ref[l][:, :H])               # (1, H)   b_ih + b_hh
        w_fc = w_ref[2 * num_layers][:H, :O]           # (H, O)   pre-transposed
        b_fc = b_ref[num_layers][:, :O]                # (1, O)

        # Layer-0 input projection hoisted out of the recurrence: one parallel
        # matmul (inputs fully available => off the serial critical path).
        xp0 = (jnp.dot(x_ref[...].reshape(B * T, D_in), w_ih[0],
                       preferred_element_type=jnp.float32)
               + bias[0]).reshape(B, T, H)

        # Wavefront-interleaved recurrence, statically unrolled.
        #   h_t^l = tanh(in_t^l @ W_ih^l + b^l + h_{t-1}^l @ W_hh^l),  h_{-1}^l = 0
        # Layer l's step t only needs layer l-1's step t, so emitting t-major
        # exposes the L independent (dot + tanh) chains to the scheduler.
        h = [None] * num_layers
        for t in range(T):
            for l in range(num_layers):
                if l == 0:
                    pre = xp0[:, t, :]                 # depends only on xp0
                else:
                    pre = (jnp.dot(h[l - 1], w_ih[l],
                                   preferred_element_type=jnp.float32)
                           + bias[l])
                if t == 0:
                    h[l] = jnp.tanh(pre)               # h_{-1} == 0: skip W_hh dot
                else:
                    h[l] = jnp.tanh(
                        pre + jnp.dot(h[l], w_hh[l],
                                      preferred_element_type=jnp.float32))
            # Park the last layer's step in VMEM scratch so only one (B, H)
            # hidden state per layer stays live in vregs.
            hs_ref[:, pl.ds(t, 1), :] = h[num_layers - 1][:, None, :]

        # Fused Linear head over every timestep: one matmul + one store.
        hs = hs_ref[...].reshape(B * T, H)
        out = jnp.dot(hs, w_fc, preferred_element_type=jnp.float32) + b_fc
        out_ref[...] = out.reshape(B, T, O)

    return kernel


def pack_params(layer_params, w_fc, b_fc):
    """Fold b_ih + b_hh and stack every weight / bias into TWO arrays.

    Done ONCE at init time (constant weights), not per forward call.
    Weights must be PRE-TRANSPOSED w.r.t. PyTorch nn.RNN / nn.Linear storage:
    w_ih (D_l, H), w_hh (H, H), w_fc (H, O).  Loading a real checkpoint
    without transposing would be silently wrong, hence the shape asserts.
    """
    num_layers = len(layer_params)
    H, O = w_fc.shape
    D_in = layer_params[0][0].shape[0]
    R = max(D_in, H)
    C = max(H, O)

    w_all = jnp.zeros((2 * num_layers + 1, R, C), jnp.float32)
    b_all = jnp.zeros((num_layers + 1, 1, C), jnp.float32)
    for l, (w_ih, w_hh, b_ih, b_hh) in enumerate(layer_params):
        d_l = D_in if l == 0 else H
        assert w_ih.shape == (d_l, H), "w_ih must be pre-transposed to (D_l, H)"
        assert w_hh.shape == (H, H), "w_hh must be pre-transposed to (H, H)"
        w_all = w_all.at[2 * l, :d_l, :H].set(w_ih)
        w_all = w_all.at[2 * l + 1, :H, :H].set(w_hh)
        b_all = b_all.at[l, :, :H].set((b_ih + b_hh).reshape(1, H))
    assert w_fc.shape == (H, O), "w_fc must be pre-transposed to (H, O)"
    w_all = w_all.at[2 * num_layers, :H, :O].set(w_fc)
    b_all = b_all.at[num_layers, :, :O].set(b_fc.reshape(1, O))
    return w_all, b_all


def net_forward(x, w_all, b_all, *, num_layers, hidden_dim, output_dim):
    """x: (B, T, D_in) batch_first; packed params from pack_params. -> (B, T, O)."""
    B, T, D_in = x.shape
    H, O = hidden_dim, output_dim

    kernel = _make_rnn_fc_kernel(num_layers, B, T, D_in, H, O)
    # Gridless: everything fits comfortably in VMEM at these toy sizes.
    # For production sizes: add a batch grid with
    # dimension_semantics=("parallel",) (shards across v7x's two TensorCores),
    # pad H/O to multiples of 128 (256 preferred on v6e/v7x, bf16 MXU operands
    # with f32 accumulation; keep f32 elementwise math on v5e), and re-derive
    # the VMEM budget for v7x's 64 MiB (vmem_limit_bytes ~48-56 MiB there).
    return pl.pallas_call(
        kernel,
        out_shape=jax.ShapeDtypeStruct((B, T, O), jnp.float32),
        in_specs=[pl.BlockSpec(memory_space=pltpu.MemorySpace.VMEM)] * 3,
        out_specs=pl.BlockSpec(memory_space=pltpu.MemorySpace.VMEM),
        scratch_shapes=[pltpu.VMEM((B, T, H), jnp.float32)],
        compiler_params=pltpu.CompilerParams(
            vmem_limit_bytes=32 * 1024 * 1024),
    )(x, w_all, b_all)


def init_params(key, input_dim, hidden_dim, output_dim, layers):
    """Deterministic init mirroring nn.RNN / nn.Linear shapes (pre-transposed)."""
    k = 1.0 / jnp.sqrt(hidden_dim)
    layer_params = []
    for l in range(layers):
        d_in = input_dim if l == 0 else hidden_dim
        key, k1, k2, k3, k4 = jax.random.split(key, 5)
        w_ih = jax.random.uniform(k1, (d_in, hidden_dim), jnp.float32, -k, k)
        w_hh = jax.random.uniform(k2, (hidden_dim, hidden_dim), jnp.float32, -k, k)
        b_ih = jax.random.uniform(k3, (1, hidden_dim), jnp.float32, -k, k)
        b_hh = jax.random.uniform(k4, (1, hidden_dim), jnp.float32, -k, k)
        layer_params.append((w_ih, w_hh, b_ih, b_hh))
    key, k5, k6 = jax.random.split(key, 3)
    w_fc = jax.random.uniform(k5, (hidden_dim, output_dim), jnp.float32, -k, k)
    b_fc = jax.random.uniform(k6, (1, output_dim), jnp.float32, -k, k)
    return layer_params, w_fc, b_fc


def reference_forward(x, layer_params, w_fc, b_fc):
    """Pure-JAX reference of the same forward pass (nn.RNN + nn.Linear)."""
    h_seq = x
    for (w_ih, w_hh, b_ih, b_hh) in layer_params:
        B, T, _ = h_seq.shape
        H = w_hh.shape[0]
        h = jnp.zeros((B, H), jnp.float32)
        outs = []
        for t in range(T):
            h = jnp.tanh(h_seq[:, t, :] @ w_ih + h @ w_hh + b_ih + b_hh)
            outs.append(h)
        h_seq = jnp.stack(outs, axis=1)
    return h_seq @ w_fc + b_fc


if __name__ == "__main__":
    INPUT_DIM, HIDDEN_DIM, OUTPUT_DIM, LAYERS = 4, 32, 4, 2
    BATCH, SEQ = 2, 8

    key = jax.random.PRNGKey(0)
    key, xkey = jax.random.split(key)
    x = jax.random.normal(xkey, (BATCH, SEQ, INPUT_DIM), jnp.float32)

    layer_params, w_fc, b_fc = init_params(
        key, INPUT_DIM, HIDDEN_DIM, OUTPUT_DIM, LAYERS)

    # Fold biases + pack all parameters ONCE (init time), not per call.
    w_all, b_all = pack_params(layer_params, w_fc, b_fc)

    out = net_forward(x, w_all, b_all,
                      num_layers=LAYERS,
                      hidden_dim=HIDDEN_DIM,
                      output_dim=OUTPUT_DIM)
    out = jax.block_until_ready(out)

    ref = reference_forward(x, layer_params, w_fc, b_fc)
    assert out.shape == (BATCH, SEQ, OUTPUT_DIM)
    assert jnp.allclose(out, ref, atol=1e-5, rtol=1e-5)

    print("KERNEL_OK")
</pallas_src>

<mosaic_0001>
module attributes {stable_mosaic.version = 11 : i64} {
  func.func @kernel(%arg0: memref<2x8x4xf32, #tpu.memory_space<vmem>>, %arg1: memref<5x32x32xf32, #tpu.memory_space<vmem>>, %arg2: memref<3x1x32xf32, #tpu.memory_space<vmem>>, %arg3: memref<2x8x4xf32, #tpu.memory_space<vmem>>, %arg4: memref<2x8x32xf32, #tpu.memory_space<vmem>>) attributes {dimension_semantics = [], scalar_prefetch = 0 : i64, scratch_operands = 1 : i64, tpu.core_type = #tpu.core_type<tc>} {
    %c0 = arith.constant 0 : index
    %c0_0 = arith.constant 0 : index
    %c0_1 = arith.constant 0 : index
    %0 = vector.load %arg1[%c0, %c0_0, %c0_1] : memref<5x32x32xf32, #tpu.memory_space<vmem>>, vector<1x32x32xf32>
    %1 = vector.shape_cast %0 : vector<1x32x32xf32> to vector<32x32xf32>
    %2 = vector.extract_strided_slice %1 {offsets = [0, 0], sizes = [4, 32], strides = [1, 1]} : vector<32x32xf32> to vector<4x32xf32>
    %c1 = arith.constant 1 : index
    %c0_2 = arith.constant 0 : index
    %c0_3 = arith.constant 0 : index
    %3 = vector.load %arg1[%c1, %c0_2, %c0_3] : memref<5x32x32xf32, #tpu.memory_space<vmem>>, vector<1x32x32xf32>
    %4 = vector.shape_cast %3 : vector<1x32x32xf32> to vector<32x32xf32>
    %c0_4 = arith.constant 0 : index
    %c0_5 = arith.constant 0 : index
    %c0_6 = arith.constant 0 : index
    %5 = vector.load %arg2[%c0_4, %c0_5, %c0_6] : memref<3x1x32xf32, #tpu.memory_space<vmem>>, vector<1x1x32xf32>
    %6 = vector.shape_cast %5 : vector<1x1x32xf32> to vector<1x32xf32>
    %c2 = arith.constant 2 : index
    %c0_7 = arith.constant 0 : index
    %c0_8 = arith.constant 0 : index
    %7 = vector.load %arg1[%c2, %c0_7, %c0_8] : memref<5x32x32xf32, #tpu.memory_space<vmem>>, vector<1x32x32xf32>
    %8 = vector.shape_cast %7 : vector<1x32x32xf32> to vector<32x32xf32>
    %c3 = arith.constant 3 : index
    %c0_9 = arith.constant 0 : index
    %c0_10 = arith.constant 0 : index
    %9 = vector.load %arg1[%c3, %c0_9, %c0_10] : memref<5x32x32xf32, #tpu.memory_space<vmem>>, vector<1x32x32xf32>
    %10 = vector.shape_cast %9 : vector<1x32x32xf32> to vector<32x32xf32>
    %c1_11 = arith.constant 1 : index
    %c0_12 = arith.constant 0 : index
    %c0_13 = arith.constant 0 : index
    %11 = vector.load %arg2[%c1_11, %c0_12, %c0_13] : memref<3x1x32xf32, #tpu.memory_space<vmem>>, vector<1x1x32xf32>
    %12 = vector.shape_cast %11 : vector<1x1x32xf32> to vector<1x32xf32>
    %c4 = arith.constant 4 : index
    %c0_14 = arith.constant 0 : index
    %c0_15 = arith.constant 0 : index
    %13 = vector.load %arg1[%c4, %c0_14, %c0_15] : memref<5x32x32xf32, #tpu.memory_space<vmem>>, vector<1x32x32xf32>
    %14 = vector.shape_cast %13 : vector<1x32x32xf32> to vector<32x32xf32>
    %15 = vector.extract_strided_slice %14 {offsets = [0, 0], sizes = [32, 4], strides = [1, 1]} : vector<32x32xf32> to vector<32x4xf32>
    %c2_16 = arith.constant 2 : index
    %c0_17 = arith.constant 0 : index
    %c0_18 = arith.constant 0 : index
    %16 = vector.load %arg2[%c2_16, %c0_17, %c0_18] : memref<3x1x32xf32, #tpu.memory_space<vmem>>, vector<1x1x32xf32>
    %17 = vector.shape_cast %16 : vector<1x1x32xf32> to vector<1x32xf32>
    %18 = vector.extract_strided_slice %17 {offsets = [0, 0], sizes = [1, 4], strides = [1, 1]} : vector<1x32xf32> to vector<1x4xf32>
    %c0_19 = arith.constant 0 : index
    %c0_20 = arith.constant 0 : index
    %c0_21 = arith.constant 0 : index
    %19 = vector.load %arg0[%c0_19, %c0_20, %c0_21] : memref<2x8x4xf32, #tpu.memory_space<vmem>>, vector<2x8x4xf32>
    %20 = vector.shape_cast %19 : vector<2x8x4xf32> to vector<16x4xf32>
    %cst = arith.constant dense<0.000000e+00> : vector<16x32xf32>
    %21 = tpu.matmul %20, %2, %cst {dimension_numbers = #tpu.dot_dimension_numbers<[1], [0], [0], [1], [0, 0, 1, 1], [], []>} : vector<16x4xf32>, vector<4x32xf32>, vector<16x32xf32> -> vector<16x32xf32>
    %22 = vector.broadcast %6 : vector<1x32xf32> to vector<16x32xf32>
    %23 = arith.addf %21, %22 : vector<16x32xf32>
    %24 = vector.shape_cast %23 : vector<16x32xf32> to vector<2x8x32xf32>
    %25 = vector.extract_strided_slice %24 {offsets = [0, 0, 0], sizes = [2, 1, 32], strides = [1, 1, 1]} : vector<2x8x32xf32> to vector<2x1x32xf32>
    %26 = vector.shape_cast %25 : vector<2x1x32xf32> to vector<2x32xf32>
    %27 = math.tanh %26 : vector<2x32xf32>
    %cst_22 = arith.constant dense<0.000000e+00> : vector<2x32xf32>
    %28 = tpu.matmul %27, %8, %cst_22 {dimension_numbers = #tpu.dot_dimension_numbers<[1], [0], [0], [1], [0, 0, 1, 1], [], []>} : vector<2x32xf32>, vector<32x32xf32>, vector<2x32xf32> -> vector<2x32xf32>
    %29 = vector.broadcast %12 : vector<1x32xf32> to vector<2x32xf32>
    %30 = arith.addf %28, %29 : vector<2x32xf32>
    %31 = math.tanh %30 : vector<2x32xf32>
    %32 = vector.shape_cast %31 : vector<2x32xf32> to vector<2x1x32xf32>
    %c0_23 = arith.constant 0 : index
    %c0_24 = arith.constant 0 : index
    %c0_25 = arith.constant 0 : index
    %33 = vector.load %arg4[%c0_23, %c0_24, %c0_25] : memref<2x8x32xf32, #tpu.memory_space<vmem>>, vector<2x1x32xf32>
    tpu.vector_store %arg4[%c0_23, %c0_24, %c0_25], %32 {strides = array<i32>} : memref<2x8x32xf32, #tpu.memory_space<vmem>>, vector<2x1x32xf32>,
    %34 = vector.extract_strided_slice %24 {offsets = [0, 1, 0], sizes = [2, 1, 32], strides = [1, 1, 1]} : vector<2x8x32xf32> to vector<2x1x32xf32>
    %35 = vector.shape_cast %34 : vector<2x1x32xf32> to vector<2x32xf32>
    %cst_26 = arith.constant dense<0.000000e+00> : vector<2x32xf32>
    %36 = tpu.matmul %27, %4, %cst_26 {dimension_numbers = #tpu.dot_dimension_numbers<[1], [0], [0], [1], [0, 0, 1, 1], [], []>} : vector<2x32xf32>, vector<32x32xf32>, vector<2x32xf32> -> vector<2x32xf32>
    %37 = arith.addf %35, %36 : vector<2x32xf32>
    %38 = math.tanh %37 : vector<2x32xf32>
    %cst_27 = arith.constant dense<0.000000e+00> : vector<2x32xf32>
    %39 = tpu.matmul %38, %8, %cst_27 {dimension_numbers = #tpu.dot_dimension_numbers<[1], [0], [0], [1], [0, 0, 1, 1], [], []>} : vector<2x32xf32>, vector<32x32xf32>, vector<2x32xf32> -> vector<2x32xf32>
    %40 = vector.broadcast %12 : vector<1x32xf32> to vector<2x32xf32>
    %41 = arith.addf %39, %40 : vector<2x32xf32>
    %cst_28 = arith.constant dense<0.000000e+00> : vector<2x32xf32>
    %42 = tpu.matmul %31, %10, %cst_28 {dimension_numbers = #tpu.dot_dimension_numbers<[1], [0], [0], [1], [0, 0, 1, 1], [], []>} : vector<2x32xf32>, vector<32x32xf32>, vector<2x32xf32> -> vector<2x32xf32>
    %43 = arith.addf %41, %42 : vector<2x32xf32>
    %44 = math.tanh %43 : vector<2x32xf32>
    %45 = vector.shape_cast %44 : vector<2x32xf32> to vector<2x1x32xf32>
    %c0_29 = arith.constant 0 : index
    %c1_30 = arith.constant 1 : index
    %c0_31 = arith.constant 0 : index
    %46 = vector.load %arg4[%c0_29, %c1_30, %c0_31] : memref<2x8x32xf32, #tpu.memory_space<vmem>>, vector<2x1x32xf32>
    tpu.vector_store %arg4[%c0_29, %c1_30, %c0_31], %45 {strides = array<i32>} : memref<2x8x32xf32, #tpu.memory_space<vmem>>, vector<2x1x32xf32>,
    %47 = vector.extract_strided_slice %24 {offsets = [0, 2, 0], sizes = [2, 1, 32], strides = [1, 1, 1]} : vector<2x8x32xf32> to vector<2x1x32xf32>
    %48 = vector.shape_cast %47 : vector<2x1x32xf32> to vector<2x32xf32>
    %cst_32 = arith.constant dense<0.000000e+00> : vector<2x32xf32>
    %49 = tpu.matmul %38, %4, %cst_32 {dimension_numbers = #tpu.dot_dimension_numbers<[1], [0], [0], [1], [0, 0, 1, 1], [], []>} : vector<2x32xf32>, vector<32x32xf32>, vector<2x32xf32> -> vector<2x32xf32>
    %50 = arith.addf %48, %49 : vector<2x32xf32>
    %51 = math.tanh %50 : vector<2x32xf32>
    %cst_33 = arith.constant dense<0.000000e+00> : vector<2x32xf32>
    %52 = tpu.matmul %51, %8, %cst_33 {dimension_numbers = #tpu.dot_dimension_numbers<[1], [0], [0], [1], [0, 0, 1, 1], [], []>} : vector<2x32xf32>, vector<32x32xf32>, vector<2x32xf32> -> vector<2x32xf32>
    %53 = vector.broadcast %12 : vector<1x32xf32> to vector<2x32xf32>
    %54 = arith.addf %52, %53 : vector<2x32xf32>
    %cst_34 = arith.constant dense<0.000000e+00> : vector<2x32xf32>
    %55 = tpu.matmul %44, %10, %cst_34 {dimension_numbers = #tpu.dot_dimension_numbers<[1], [0], [0], [1], [0, 0, 1, 1], [], []>} : vector<2x32xf32>, vector<32x32xf32>, vector<2x32xf32> -> vector<2x32xf32>
    %56 = arith.addf %54, %55 : vector<2x32xf32>
    %57 = math.tanh %56 : vector<2x32xf32>
    %58 = vector.shape_cast %57 : vector<2x32xf32> to vector<2x1x32xf32>
    %c0_35 = arith.constant 0 : index
    %c2_36 = arith.constant 2 : index
    %c0_37 = arith.constant 0 : index
    %59 = vector.load %arg4[%c0_35, %c2_36, %c0_37] : memref<2x8x32xf32, #tpu.memory_space<vmem>>, vector<2x1x32xf32>
    tpu.vector_store %arg4[%c0_35, %c2_36, %c0_37], %58 {strides = array<i32>} : memref<2x8x32xf32, #tpu.memory_space<vmem>>, vector<2x1x32xf32>,
    %60 = vector.extract_strided_slice %24 {offsets = [0, 3, 0], sizes = [2, 1, 32], strides = [1, 1, 1]} : vector<2x8x32xf32> to vector<2x1x32xf32>
    %61 = vector.shape_cast %60 : vector<2x1x32xf32> to vector<2x32xf32>
    %cst_38 = arith.constant dense<0.000000e+00> : vector<2x32xf32>
    %62 = tpu.matmul %51, %4, %cst_38 {dimension_numbers = #tpu.dot_dimension_numbers<[1], [0], [0], [1], [0, 0, 1, 1], [], []>} : vector<2x32xf32>, vector<32x32xf32>, vector<2x32xf32> -> vector<2x32xf32>
    %63 = arith.addf %61, %62 : vector<2x32xf32>
    %64 = math.tanh %63 : vector<2x32xf32>
    %cst_39 = arith.constant dense<0.000000e+00> : vector<2x32xf32>
    %65 = tpu.matmul %64, %8, %cst_39 {dimension_numbers = #tpu.dot_dimension_numbers<[1], [0], [0], [1], [0, 0, 1, 1], [], []>} : vector<2x32xf32>, vector<32x32xf32>, vector<2x32xf32> -> vector<2x32xf32>
    %66 = vector.broadcast %12 : vector<1x32xf32> to vector<2x32xf32>
    %67 = arith.addf %65, %66 : vector<2x32xf32>
    %cst_40 = arith.constant dense<0.000000e+00> : vector<2x32xf32>
    %68 = tpu.matmul %57, %10, %cst_40 {dimension_numbers = #tpu.dot_dimension_numbers<[1], [0], [0], [1], [0, 0, 1, 1], [], []>} : vector<2x32xf32>, vector<32x32xf32>, vector<2x32xf32> -> vector<2x32xf32>
    %69 = arith.addf %67, %68 : vector<2x32xf32>
    %70 = math.tanh %69 : vector<2x32xf32>
    %71 = vector.shape_cast %70 : vector<2x32xf32> to vector<2x1x32xf32>
    %c0_41 = arith.constant 0 : index
    %c3_42 = arith.constant 3 : index
    %c0_43 = arith.constant 0 : index
    %72 = vector.load %arg4[%c0_41, %c3_42, %c0_43] : memref<2x8x32xf32, #tpu.memory_space<vmem>>, vector<2x1x32xf32>
    tpu.vector_store %arg4[%c0_41, %c3_42, %c0_43], %71 {strides = array<i32>} : memref<2x8x32xf32, #tpu.memory_space<vmem>>, vector<2x1x32xf32>,
    %73 = vector.extract_strided_slice %24 {offsets = [0, 4, 0], sizes = [2, 1, 32], strides = [1, 1, 1]} : vector<2x8x32xf32> to vector<2x1x32xf32>
    %74 = vector.shape_cast %73 : vector<2x1x32xf32> to vector<2x32xf32>
    %cst_44 = arith.constant dense<0.000000e+00> : vector<2x32xf32>
    %75 = tpu.matmul %64, %4, %cst_44 {dimension_numbers = #tpu.dot_dimension_numbers<[1], [0], [0], [1], [0, 0, 1, 1], [], []>} : vector<2x32xf32>, vector<32x32xf32>, vector<2x32xf32> -> vector<2x32xf32>
    %76 = arith.addf %74, %75 : vector<2x32xf32>
    %77 = math.tanh %76 : vector<2x32xf32>
    %cst_45 = arith.constant dense<0.000000e+00> : vector<2x32xf32>
    %78 = tpu.matmul %77, %8, %cst_45 {dimension_numbers = #tpu.dot_dimension_numbers<[1], [0], [0], [1], [0, 0, 1, 1], [], []>} : vector<2x32xf32>, vector<32x32xf32>, vector<2x32xf32> -> vector<2x32xf32>
    %79 = vector.broadcast %12 : vector<1x32xf32> to vector<2x32xf32>
    %80 = arith.addf %78, %79 : vector<2x32xf32>
    %cst_46 = arith.constant dense<0.000000e+00> : vector<2x32xf32>
    %81 = tpu.matmul %70, %10, %cst_46 {dimension_numbers = #tpu.dot_dimension_numbers<[1], [0], [0], [1], [0, 0, 1, 1], [], []>} : vector<2x32xf32>, vector<32x32xf32>, vector<2x32xf32> -> vector<2x32xf32>
    %82 = arith.addf %80, %81 : vector<2x32xf32>
    %83 = math.tanh %82 : vector<2x32xf32>
    %84 = vector.shape_cast %83 : vector<2x32xf32> to vector<2x1x32xf32>
    %c0_47 = arith.constant 0 : index
    %c4_48 = arith.constant 4 : index
    %c0_49 = arith.constant 0 : index
    %85 = vector.load %arg4[%c0_47, %c4_48, %c0_49] : memref<2x8x32xf32, #tpu.memory_space<vmem>>, vector<2x1x32xf32>
    tpu.vector_store %arg4[%c0_47, %c4_48, %c0_49], %84 {strides = array<i32>} : memref<2x8x32xf32, #tpu.memory_space<vmem>>, vector<2x1x32xf32>,
    %86 = vector.extract_strided_slice %24 {offsets = [0, 5, 0], sizes = [2, 1, 32], strides = [1, 1, 1]} : vector<2x8x32xf32> to vector<2x1x32xf32>
    %87 = vector.shape_cast %86 : vector<2x1x32xf32> to vector<2x32xf32>
    %cst_50 = arith.constant dense<0.000000e+00> : vector<2x32xf32>
    %88 = tpu.matmul %77, %4, %cst_50 {dimension_numbers = #tpu.dot_dimension_numbers<[1], [0], [0], [1], [0, 0, 1, 1], [], []>} : vector<2x32xf32>, vector<32x32xf32>, vector<2x32xf32> -> vector<2x32xf32>
    %89 = arith.addf %87, %88 : vector<2x32xf32>
    %90 = math.tanh %89 : vector<2x32xf32>
    %cst_51 = arith.constant dense<0.000000e+00> : vector<2x32xf32>
    %91 = tpu.matmul %90, %8, %cst_51 {dimension_numbers = #tpu.dot_dimension_numbers<[1], [0], [0], [1], [0, 0, 1, 1], [], []>} : vector<2x32xf32>, vector<32x32xf32>, vector<2x32xf32> -> vector<2x32xf32>
    %92 = vector.broadcast %12 : vector<1x32xf32> to vector<2x32xf32>
    %93 = arith.addf %91, %92 : vector<2x32xf32>
    %cst_52 = arith.constant dense<0.000000e+00> : vector<2x32xf32>
    %94 = tpu.matmul %83, %10, %cst_52 {dimension_numbers = #tpu.dot_dimension_numbers<[1], [0], [0], [1], [0, 0, 1, 1], [], []>} : vector<2x32xf32>, vector<32x32xf32>, vector<2x32xf32> -> vector<2x32xf32>
    %95 = arith.addf %93, %94 : vector<2x32xf32>
    %96 = math.tanh %95 : vector<2x32xf32>
    %97 = vector.shape_cast %96 : vector<2x32xf32> to vector<2x1x32xf32>
    %c0_53 = arith.constant 0 : index
    %c5 = arith.constant 5 : index
    %c0_54 = arith.constant 0 : index
    %98 = vector.load %arg4[%c0_53, %c5, %c0_54] : memref<2x8x32xf32, #tpu.memory_space<vmem>>, vector<2x1x32xf32>
    tpu.vector_store %arg4[%c0_53, %c5, %c0_54], %97 {strides = array<i32>} : memref<2x8x32xf32, #tpu.memory_space<vmem>>, vector<2x1x32xf32>,
    %99 = vector.extract_strided_slice %24 {offsets = [0, 6, 0], sizes = [2, 1, 32], strides = [1, 1, 1]} : vector<2x8x32xf32> to vector<2x1x32xf32>
    %100 = vector.shape_cast %99 : vector<2x1x32xf32> to vector<2x32xf32>
    %cst_55 = arith.constant dense<0.000000e+00> : vector<2x32xf32>
    %101 = tpu.matmul %90, %4, %cst_55 {dimension_numbers = #tpu.dot_dimension_numbers<[1], [0], [0], [1], [0, 0, 1, 1], [], []>} : vector<2x32xf32>, vector<32x32xf32>, vector<2x32xf32> -> vector<2x32xf32>
    %102 = arith.addf %100, %101 : vector<2x32xf32>
    %103 = math.tanh %102 : vector<2x32xf32>
    %cst_56 = arith.constant dense<0.000000e+00> : vector<2x32xf32>
    %104 = tpu.matmul %103, %8, %cst_56 {dimension_numbers = #tpu.dot_dimension_numbers<[1], [0], [0], [1], [0, 0, 1, 1], [], []>} : vector<2x32xf32>, vector<32x32xf32>, vector<2x32xf32> -> vector<2x32xf32>
    %105 = vector.broadcast %12 : vector<1x32xf32> to vector<2x32xf32>
    %106 = arith.addf %104, %105 : vector<2x32xf32>
    %cst_57 = arith.constant dense<0.000000e+00> : vector<2x32xf32>
    %107 = tpu.matmul %96, %10, %cst_57 {dimension_numbers = #tpu.dot_dimension_numbers<[1], [0], [0], [1], [0, 0, 1, 1], [], []>} : vector<2x32xf32>, vector<32x32xf32>, vector<2x32xf32> -> vector<2x32xf32>
    %108 = arith.addf %106, %107 : vector<2x32xf32>
    %109 = math.tanh %108 : vector<2x32xf32>
    %110 = vector.shape_cast %109 : vector<2x32xf32> to vector<2x1x32xf32>
    %c0_58 = arith.constant 0 : index
    %c6 = arith.constant 6 : index
    %c0_59 = arith.constant 0 : index
    %111 = vector.load %arg4[%c0_58, %c6, %c0_59] : memref<2x8x32xf32, #tpu.memory_space<vmem>>, vector<2x1x32xf32>
    tpu.vector_store %arg4[%c0_58, %c6, %c0_59], %110 {strides = array<i32>} : memref<2x8x32xf32, #tpu.memory_space<vmem>>, vector<2x1x32xf32>,
    %112 = vector.extract_strided_slice %24 {offsets = [0, 7, 0], sizes = [2, 1, 32], strides = [1, 1, 1]} : vector<2x8x32xf32> to vector<2x1x32xf32>
    %113 = vector.shape_cast %112 : vector<2x1x32xf32> to vector<2x32xf32>
    %cst_60 = arith.constant dense<0.000000e+00> : vector<2x32xf32>
    %114 = tpu.matmul %103, %4, %cst_60 {dimension_numbers = #tpu.dot_dimension_numbers<[1], [0], [0], [1], [0, 0, 1, 1], [], []>} : vector<2x32xf32>, vector<32x32xf32>, vector<2x32xf32> -> vector<2x32xf32>
    %115 = arith.addf %113, %114 : vector<2x32xf32>
    %116 = math.tanh %115 : vector<2x32xf32>
    %cst_61 = arith.constant dense<0.000000e+00> : vector<2x32xf32>
    %117 = tpu.matmul %116, %8, %cst_61 {dimension_numbers = #tpu.dot_dimension_numbers<[1], [0], [0], [1], [0, 0, 1, 1], [], []>} : vector<2x32xf32>, vector<32x32xf32>, vector<2x32xf32> -> vector<2x32xf32>
    %118 = vector.broadcast %12 : vector<1x32xf32> to vector<2x32xf32>
    %119 = arith.addf %117, %118 : vector<2x32xf32>
    %cst_62 = arith.constant dense<0.000000e+00> : vector<2x32xf32>
    %120 = tpu.matmul %109, %10, %cst_62 {dimension_numbers = #tpu.dot_dimension_numbers<[1], [0], [0], [1], [0, 0, 1, 1], [], []>} : vector<2x32xf32>, vector<32x32xf32>, vector<2x32xf32> -> vector<2x32xf32>
    %121 = arith.addf %119, %120 : vector<2x32xf32>
    %122 = math.tanh %121 : vector<2x32xf32>
    %123 = vector.shape_cast %122 : vector<2x32xf32> to vector<2x1x32xf32>
    %c0_63 = arith.constant 0 : index
    %c7 = arith.constant 7 : index
    %c0_64 = arith.constant 0 : index
    %124 = vector.load %arg4[%c0_63, %c7, %c0_64] : memref<2x8x32xf32, #tpu.memory_space<vmem>>, vector<2x1x32xf32>
    tpu.vector_store %arg4[%c0_63, %c7, %c0_64], %123 {strides = array<i32>} : memref<2x8x32xf32, #tpu.memory_space<vmem>>, vector<2x1x32xf32>,
    %c0_65 = arith.constant 0 : index
    %c0_66 = arith.constant 0 : index
    %c0_67 = arith.constant 0 : index
    %125 = vector.load %arg4[%c0_65, %c0_66, %c0_67] : memref<2x8x32xf32, #tpu.memory_space<vmem>>, vector<2x8x32xf32>
    %126 = vector.shape_cast %125 : vector<2x8x32xf32> to vector<16x32xf32>
    %cst_68 = arith.constant dense<0.000000e+00> : vector<16x4xf32>
    %127 = tpu.matmul %126, %15, %cst_68 {dimension_numbers = #tpu.dot_dimension_numbers<[1], [0], [0], [1], [0, 0, 1, 1], [], []>} : vector<16x32xf32>, vector<32x4xf32>, vector<16x4xf32> -> vector<16x4xf32>
    %128 = vector.broadcast %18 : vector<1x4xf32> to vector<16x4xf32>
    %129 = arith.addf %127, %128 : vector<16x4xf32>
    %130 = vector.shape_cast %129 : vector<16x4xf32> to vector<2x8x4xf32>
    %c0_69 = arith.constant 0 : index
    %c0_70 = arith.constant 0 : index
    %c0_71 = arith.constant 0 : index
    %131 = vector.load %arg3[%c0_69, %c0_70, %c0_71] : memref<2x8x4xf32, #tpu.memory_space<vmem>>, vector<2x8x4xf32>
    tpu.vector_store %arg3[%c0_69, %c0_70, %c0_71], %130 {strides = array<i32>} : memref<2x8x4xf32, #tpu.memory_space<vmem>>, vector<2x8x4xf32>,
    return
  }
}

</mosaic_0001>

<bundles_post_ra>
// kernel: tpu_custom_call.1
= control target key start
LH: loop header
LB: loop body
LE: loop exit
PB: predicated region body
PF: predicated region fallthrough
CT: control target
= control target key end

     0   :  { %8 = vsyncpa [#allocation4], 0  ;;  %s2805_s12 = smov [#allocation3]   ;;  %s3117_s0 = inlined_call_operand.vmem [shape: f32[2,8,4], index: 0, kind: input, shape index: {}]   ;;  %s3118_s1 = inlined_call_operand.hbm [shape: f32[5,32,32], index: 1, kind: input, shape index: {}]   ;;  %s3119_s2 = inlined_call_operand.vmem [shape: f32[3,1,32], index: 2, kind: input, shape index: {}]   ;;  %s3120_s3 = inlined_call_operand.vmem [shape: f32[2,8,4], index: 3, kind: output, shape index: {}]  }
   0x1   :  { %s16_s13 = sshll.u32 %s2805_s12, 4  ;;  %s2781_s16 = scalar_lea.hbm %s3118_s1, 2560  ;;  %s17_s13 = int_to_ptr.vmem [resolvable:$true] %s16_s13 }
   0x2   :  { %p2782_p0 = scmp.ne.s32.totalorder %s3118_s1, %s2781_s16  ;;  %p2785_p1 = scmp.lt.u32.totalorder %s2781_s16, %s3118_s1 }
   0x4   :  { %p2787_p2 = pnand %p2785_p1, %p2782_p0 }
   0x6   :  { %2790 = shalt.err (!%p2787_p2)
}
   0x7   :  { %s2791_s21 = scalar_lea.vmem %s17_s13, 2560  ;;  %p2796_p4 = scmp.lt.s32.totalorder %s17_s13, %s17_s13 }
   0x8   :  { %p2792_p3 = scmp.ne.s32.totalorder %s17_s13, %s2791_s21  ;;  %p2797_p5 = scmp.lt.s32.totalorder %s2791_s21, %s2791_s21 }
   0xa   :  { %p2798_p6 = por %p2797_p5, %p2796_p4 }
   0xc   :  { %p2799_p7 = pnand %p2798_p6, %p2792_p3 }
   0xe   :  { %2802 = shalt.err (!%p2799_p7)
}
   0xf   :  { %s2806_s22 = smov 128   ;;  %s2807_s23 = smov 8  }
  0x10   :  { %22 = dma.hbm_to_vmem [thread:$0]  %s3118_s1, 2560, %s17_s13, [#allocation4], %s2806_s22, %s2806_s22, %s2807_s23  }
  0x11   :  { %2803 = dma.done.wait [#allocation4], 2560  }
  0x12   :  { %2804 = vsyncadd [#allocation4], 4294964736  ;;  %vm69_vm0 = vcmask 1043456   ;;  %vm62_vm1 = vcmask 31744   ;;  %v28_v0 = vld [vmem:[#allocation3] sm:$0xff]  ;;  %v54_v1 = vld [vmem:[%s3117_s0] sm:$0xff]  ;;  %v239_v35 = vlaneseq }
  0x13   :  { %v55_v2 = vld [vmem:[%s3117_s0 + $0x8] sm:$0xff]  ;;  %2307 = vmatprep.subr.msk.mxu0 %vm69_vm0, %v28_v0  ;;  %2309 = vmatprep.mubr.msk.f32.mxu0 %vm62_vm1, %v54_v1  ;;  %v36_v3 = vld [vmem:[#allocation3 + $0x40] sm:$0xff]  ;;  %v37_v4 = vld [vmem:[#allocation3 + $0x48] sm:$0xff]  ;;  %v2808_v6 = vmov 0.0|0.0   ;;  %vm2809_vm2 = vmmov 0   ;;  %v2810_v14 = vmov 0.0  }
  0x14   :  { %2308 = vmatpush3.msk.msra.mxu0 %vm69_vm0, %v28_v0  ;;  %v30_v5 = vld [vmem:[#allocation3 + $0x20] sm:$0xff]  ;;  %2565 = vmatprep.subr.bf16.mxu1 %v2808_v6  ;;  %v2854_v7 = vpack.c.bf16 %v37_v4, %v36_v3  ;;  %v31_v8 = vld [vmem:[#allocation3 + $0x28] sm:$0xff]  ;;  %v38_v9 = vld [vmem:[#allocation3 + $0x50] sm:$0xff]  ;;  %vm159_vm3 = vcmask 1041409   ;;  %vm161_vm4 = vcmask 261120   ;;  %v240_v39 = vshrl.u32 %v239_v35, 7 }
  0x15   :  { %2310 = vmatmul.mubr.msk.f32.vlgmr.msra.gmra.mrb[0].mxu0 %vm62_vm1, %v55_v2  ;;  %2571 = vmatprep.subr.bf16.mxu0 %v2808_v6  ;;  %v39_v10 = vld [vmem:[#allocation3 + $0x58] sm:$0xff]  ;;  %v2856_v11 = vpack.c.bf16 %v31_v8, %v30_v5  ;;  %v32_v12 = vld [vmem:[#allocation3 + $0x30] sm:$0xff]  ;;  %v2811_v33 = vmov 1966171168   ;;  %v41_v42 = vld [vmem:[#allocation3 + $0x60] sm:$0xff]  ;;  %vm260_vm5 = vcmask 253952  }
  0x16   :  { %v33_v13 = vld [vmem:[#allocation3 + $0x38] sm:$0xff]  ;;  %2320 = vmatprep.mubr.msk.f32.mxu1 %vm2809_vm2, %v2810_v14  ;;  %2331 = vmatprep.mubr.msk.f32.mxu0 %vm2809_vm2, %v2810_v14  ;;  %v2863_v15 = vpack.c.bf16 %v39_v10, %v38_v9  ;;  %v2158_v17 = vld [vmem:[%s3119_s2] ss:$0 sm:$0xff]  ;;  %v2901_v26 = vld [vmem:[%s3119_s2 + $0x1] ss:$0 sm:$0xff]  ;;  %v237_v34 = vunpack.c.l.s4 %v2811_v33 }
  0x17   :  { %2567 = vmatpush3.bf16.msra.mxu1 %v2854_v7  ;;  %2573 = vmatpush3.bf16.msra.mxu0 %v2856_v11  ;;  %v2867_v16 = vpack.c.bf16 %v33_v13, %v32_v12  ;;  %v42_v43 = vld [vmem:[#allocation3 + $0x68] sm:$0xff]  ;;  %v43_v51 = vld [vmem:[#allocation3 + $0x70] sm:$0xff]  ;;  %v44_v52 = vld [vmem:[#allocation3 + $0x78] sm:$0xff] }
  0x18   :  { %2568 = vmatprep.subr.bf16.mxu1 %v2808_v6  ;;  %2574 = vmatprep.subr.bf16.mxu0 %v2808_v6  ;;  %v238_v38 = vunpack.c.0.s8 %v237_v34  ;;  %v2910_v49 = vpack.c.bf16 %v42_v43, %v41_v42  ;;  %v2919_v55 = vpack.c.bf16 %v44_v52, %v43_v51 }
  0x1a   :  { %v2906_v40 = vsub.s32 %v238_v38, %v240_v39 }
  0x1b   :  { %2570 = vmatpush3.bf16.msra.mxu1 %v2863_v15  ;;  %2576 = vmatpush3.bf16.msra.mxu0 %v2867_v16 }
  0x1c   :  { %2577 = vmatprep.subr.bf16.mxu1 %v2808_v6  ;;  %2589 = vmatprep.subr.bf16.mxu0 %v2808_v6 }
  0xe8   :  { %v2311_v18 = vpop.f32.mrb[0].mxu0 }
  0xe9   :  { %v2877_v19 = vadd.f32 %v2311_v18, %v2158_v17  ;;  %v139_v20 = vpop.f32.mrb[1].mxu0 }
  0xea   :  { %v2879_v21 = vadd.f32 %v2158_v17, %v139_v20 }
  0xeb   :  { %2733 = vtanh.f32 %v2877_v19 }
  0xec   :  { %2735 = vtanh.f32 %v2879_v21 }
  0xf5   :  { %v2734_v22 = vpop.eup %2733 }
  0xf6   :  { %v2736_v23 = vpop.eup %2735  ;;  %v158_v24 = vrot.slane %v2734_v22, 7 }
  0xf8   :  { %v160_v25 = vsel %vm159_vm3, %v158_v24, %v2736_v23 }
  0xf9   :  { %2321 = vmatmul.mubr.msk.f32.vlgmr.msra.gmra.mrb[0].mxu1 %vm161_vm4, %v160_v25  ;;  %2332 = vmatmul.mubr.msk.f32.vlgmr.msra.gmra.mrb[2].mxu0 %vm161_vm4, %v160_v25 }
  0xfa   :  { %2579 = vmatpush3.bf16.msra.mxu1 %v2854_v7  ;;  %2591 = vmatpush3.bf16.msra.mxu0 %v2856_v11 }
  0xfb   :  { %2580 = vmatprep.subr.bf16.mxu1 %v2808_v6  ;;  %2592 = vmatprep.subr.bf16.mxu0 %v2808_v6 }
  0xfc   :  { %2342 = vmatprep.mubr.msk.f32.mxu1 %vm2809_vm2, %v2810_v14  ;;  %2364 = vmatprep.mubr.msk.f32.mxu0 %vm2809_vm2, %v2810_v14 }
  0xfe   :  { %2582 = vmatpush3.bf16.msra.mxu1 %v2863_v15  ;;  %2594 = vmatpush3.bf16.msra.mxu0 %v2867_v16 }
  0xff   :  { %2583 = vmatprep.subr.bf16.mxu1 %v2808_v6  ;;  %2595 = vmatprep.subr.bf16.mxu0 %v2808_v6 }
 0x1cc   :  { %v230_v27 = vpop.f32.mrb[0].mxu1  ;;  %v329_v28 = vpop.f32.mrb[2].mxu0 }
 0x1cd   :  { %v231_v29 = vadd.f32 %v2901_v26, %v230_v27  ;;  %v334_v30 = vrot.slane %v329_v28, 7  ;;  %v2322_v31 = vpop.f32.mrb[1].mxu1  ;;  %v2333_v32 = vpop.f32.mrb[3].mxu0  ;;  %v338_v37 = vadd.f32 %v329_v28, %v2877_v19 }
 0x1cf   :  { %2737 = vtanh.f32 %v231_v29  ;;  %v337_v36 = vadd.f32 %v334_v30, %v2879_v21 }
 0x1d1   :  { %2739 = vtanh.f32 %v337_v36 }
 0x1d2   :  { %2741 = vtanh.f32 %v338_v37 }
 0x1d9   :  { %v2738_v41 = vpop.eup %2737 }
 0x1da   :  { %v242_v44 = vrot.slane %v2738_v41, %v2906_v40 }
 0x1db   :  { %v2740_v45 = vpop.eup %2739 }
 0x1dc   :  { %v243_v46 = vcombine.high %v242_v44, %v242_v44  ;;  %v250_v47 = vrot.slane %v242_v44, %v2906_v40  ;;  %v343_v48 = vrot.slane %v2740_v45, 1  ;;  %v2742_v50 = vpop.eup %2741 }
 0x1de   :  { %v257_v53 = vrot.slane %v243_v46, %v2906_v40  ;;  %261 = vst.msk [vmem:[#allocation2] sm:$0x1] %vm260_vm5, %v250_v47  ;;  %v344_v54 = vsel %vm159_vm3, %v2742_v50, %v343_v48 }
 0x1df   :  { %2343 = vmatmul.mubr.msk.f32.vlgmr.msra.gmra.mrb[2].mxu1 %vm161_vm4, %v344_v54  ;;  %2365 = vmatmul.mubr.msk.f32.vlgmr.msra.gmra.mrb[4].mxu0 %vm161_vm4, %v344_v54 }
 0x1e0   :  { %262 = vst.msk [vmem:[#allocation2 + $0x8] sm:$0x1] %vm260_vm5, %v257_v53  ;;  %2585 = vmatpush3.bf16.msra.mxu1 %v2910_v49  ;;  %2353 = vmatprep.mubr.msk.f32.mxu1 %vm2809_vm2, %v2810_v14 }
 0x1e1   :  { %2586 = vmatprep.subr.bf16.mxu1 %v2808_v6  ;;  %2597 = vmatpush3.bf16.msra.mxu0 %v2854_v7 }
 0x1e2   :  { %2598 = vmatprep.subr.bf16.mxu0 %v2808_v6  ;;  %2375 = vmatprep.mubr.msk.f32.mxu0 %vm2809_vm2, %v2810_v14 }
 0x1e4   :  { %2588 = vmatpush3.bf16.msra.mxu1 %v2919_v55 }
 0x1e5   :  { %2607 = vmatprep.subr.bf16.mxu1 %v2808_v6  ;;  %2600 = vmatpush3.bf16.msra.mxu0 %v2863_v15 }
 0x1e6   :  { %2601 = vmatprep.subr.bf16.mxu0 %v2808_v6 }
 0x1e7   :  { %2354 = vmatmul.mubr.msk.f32.vlgmr.msra.gmra.mrb[2].mxu1 %vm161_vm4, %v2738_v41 }
 0x1e8   :  { %2609 = vmatpush3.bf16.msra.mxu1 %v2856_v11  ;;  %2397 = vmatprep.mubr.msk.f32.mxu1 %vm2809_vm2, %v2810_v14 }
 0x1e9   :  { %2610 = vmatprep.subr.bf16.mxu1 %v2808_v6 }
 0x1ec   :  { %2612 = vmatpush3.bf16.msra.mxu1 %v2867_v16 }
 0x1ed   :  { %2613 = vmatprep.subr.bf16.mxu1 %v2808_v6 }
 0x2b2   :  { %v584_v56 = vpop.f32.mrb[4].mxu0 }
 0x2b3   :  { %v589_v57 = vrot.slane %v584_v56, 6  ;;  %v590_v58 = vrot.slane %v584_v56, 7  ;;  %v2366_v59 = vpop.f32.mrb[5].mxu0 }
 0x2b5   :  { %v593_v60 = vadd.f32 %v589_v57, %v2879_v21  ;;  %v594_v61 = vadd.f32 %v590_v58, %v2877_v19 }
 0x2b7   :  { %2743 = vtanh.f32 %v593_v60 }
 0x2b8   :  { %2745 = vtanh.f32 %v594_v61 }
 0x2ba   :  { %v485_v62 = vpop.f32.mrb[2].mxu1 }
 0x2bb   :  { %v2705_v63 = vadd.f32 %v2901_v26, %v485_v62  ;;  %v2355_v0 = vpop.f32.mrb[3].mxu1 }
 0x2bd   :  { %2747 = vtanh.f32 %v2705_v63 }
 0x2c1   :  { %v2744_v1 = vpop.eup %2743 }
 0x2c2   :  { %v2746_v2 = vpop.eup %2745  ;;  %v599_v3 = vrot.slane %v2744_v1, 2 }
 0x2c3   :  { %v600_v4 = vrot.slane %v2746_v2, 1 }
 0x2c5   :  { %v601_v5 = vsel %vm159_vm3, %v600_v4, %v599_v3 }
 0x2c6   :  { %2376 = vmatmul.mubr.msk.f32.vlgmr.msra.gmra.mrb[6].mxu0 %vm161_vm4, %v601_v5  ;;  %2398 = vmatmul.mubr.msk.f32.vlgmr.msra.gmra.mrb[4].mxu1 %vm161_vm4, %v601_v5 }
 0x2c7   :  { %v2748_v8 = vpop.eup %2747  ;;  %2603 = vmatpush3.bf16.msra.mxu0 %v2910_v49  ;;  %2386 = vmatprep.mubr.msk.f32.mxu0 %vm2809_vm2, %v2810_v14 }
 0x2c8   :  { %v498_v9 = vrot.slane %v2748_v8, %v2906_v40  ;;  %2604 = vmatprep.subr.bf16.mxu0 %v2808_v6  ;;  %2615 = vmatpush3.bf16.msra.mxu1 %v2854_v7 }
 0x2c9   :  { %2616 = vmatprep.subr.bf16.mxu1 %v2808_v6  ;;  %2408 = vmatprep.mubr.msk.f32.mxu1 %vm2809_vm2, %v2810_v14 }
 0x2ca   :  { %v499_v10 = vcombine.high %v498_v9, %v498_v9  ;;  %v506_v12 = vrot.slane %v498_v9, %v2906_v40 }
 0x2cb   :  { %2606 = vmatpush3.bf16.msra.mxu0 %v2919_v55 }
 0x2cc   :  { %v513_v13 = vrot.slane %v499_v10, %v2906_v40  ;;  %516 = vst.msk [vmem:[#allocation2 + $0x1] sm:$0x1] %vm260_vm5, %v506_v12  ;;  %2625 = vmatprep.subr.bf16.mxu0 %v2808_v6  ;;  %2618 = vmatpush3.bf16.msra.mxu1 %v2863_v15 }
 0x2cd   :  { %2619 = vmatprep.subr.bf16.mxu1 %v2808_v6 }
 0x2ce   :  { %517 = vst.msk [vmem:[#allocation2 + $0x9] sm:$0x1] %vm260_vm5, %v513_v13  ;;  %2387 = vmatmul.mubr.msk.f32.vlgmr.msra.gmra.mrb[6].mxu0 %vm161_vm4, %v2748_v8 }
 0x2cf   :  { %2627 = vmatpush3.bf16.msra.mxu0 %v2856_v11  ;;  %2430 = vmatprep.mubr.msk.f32.mxu0 %vm2809_vm2, %v2810_v14 }
 0x2d0   :  { %2628 = vmatprep.subr.bf16.mxu0 %v2808_v6 }
 0x2d3   :  { %2630 = vmatpush3.bf16.msra.mxu0 %v2867_v16 }
 0x2d4   :  { %2631 = vmatprep.subr.bf16.mxu0 %v2808_v6 }
 0x399   :  { %v841_v17 = vpop.f32.mrb[4].mxu1 }
 0x39a   :  { %v846_v18 = vrot.slane %v841_v17, 5  ;;  %v847_v20 = vrot.slane %v841_v17, 6  ;;  %v2399_v22 = vpop.f32.mrb[5].mxu1 }
 0x39c   :  { %v850_v23 = vadd.f32 %v846_v18, %v2879_v21  ;;  %v851_v24 = vadd.f32 %v847_v20, %v2877_v19 }
 0x39e   :  { %2749 = vtanh.f32 %v850_v23 }
 0x39f   :  { %2751 = vtanh.f32 %v851_v24 }
 0x3a1   :  { %v742_v25 = vpop.f32.mrb[6].mxu0 }
 0x3a2   :  { %v2706_v27 = vadd.f32 %v2901_v26, %v742_v25  ;;  %v2388_v28 = vpop.f32.mrb[7].mxu0 }
 0x3a4   :  { %2753 = vtanh.f32 %v2706_v27 }
 0x3a8   :  { %v2750_v29 = vpop.eup %2749 }
 0x3a9   :  { %v2752_v30 = vpop.eup %2751  ;;  %v856_v31 = vrot.slane %v2750_v29, 3 }
 0x3aa   :  { %v857_v32 = vrot.slane %v2752_v30, 2 }
 0x3ac   :  { %v858_v33 = vsel %vm159_vm3, %v857_v32, %v856_v31 }
 0x3ad   :  { %2409 = vmatmul.mubr.msk.f32.vlgmr.msra.gmra.mrb[6].mxu1 %vm161_vm4, %v858_v33  ;;  %2431 = vmatmul.mubr.msk.f32.vlgmr.msra.gmra.mrb[8].mxu0 %vm161_vm4, %v858_v33 }
 0x3ae   :  { %v2754_v34 = vpop.eup %2753  ;;  %2621 = vmatpush3.bf16.msra.mxu1 %v2910_v49  ;;  %2419 = vmatprep.mubr.msk.f32.mxu1 %vm2809_vm2, %v2810_v14 }
 0x3af   :  { %v755_v35 = vrot.slane %v2754_v34, %v2906_v40  ;;  %2622 = vmatprep.subr.bf16.mxu1 %v2808_v6  ;;  %2633 = vmatpush3.bf16.msra.mxu0 %v2854_v7 }
 0x3b0   :  { %2634 = vmatprep.subr.bf16.mxu0 %v2808_v6  ;;  %2441 = vmatprep.mubr.msk.f32.mxu0 %vm2809_vm2, %v2810_v14 }
 0x3b1   :  { %v756_v36 = vcombine.high %v755_v35, %v755_v35  ;;  %v763_v37 = vrot.slane %v755_v35, %v2906_v40 }
 0x3b2   :  { %2624 = vmatpush3.bf16.msra.mxu1 %v2919_v55 }
 0x3b3   :  { %v770_v38 = vrot.slane %v756_v36, %v2906_v40  ;;  %773 = vst.msk [vmem:[#allocation2 + $0x2] sm:$0x1] %vm260_vm5, %v763_v37  ;;  %2643 = vmatprep.subr.bf16.mxu1 %v2808_v6  ;;  %2636 = vmatpush3.bf16.msra.mxu0 %v2863_v15 }
 0x3b4   :  { %2637 = vmatprep.subr.bf16.mxu0 %v2808_v6 }
 0x3b5   :  { %774 = vst.msk [vmem:[#allocation2 + $0xa] sm:$0x1] %vm260_vm5, %v770_v38  ;;  %2420 = vmatmul.mubr.msk.f32.vlgmr.msra.gmra.mrb[6].mxu1 %vm161_vm4, %v2754_v34 }
 0x3b6   :  { %2645 = vmatpush3.bf16.msra.mxu1 %v2856_v11  ;;  %2463 = vmatprep.mubr.msk.f32.mxu1 %vm2809_vm2, %v2810_v14 }
 0x3b7   :  { %2646 = vmatprep.subr.bf16.mxu1 %v2808_v6 }
 0x3ba   :  { %2648 = vmatpush3.bf16.msra.mxu1 %v2867_v16 }
 0x3bb   :  { %2649 = vmatprep.subr.bf16.mxu1 %v2808_v6 }
 0x480   :  { %v1098_v39 = vpop.f32.mrb[8].mxu0 }
 0x481   :  { %v1103_v41 = vrot.slane %v1098_v39, 4  ;;  %v1104_v42 = vrot.slane %v1098_v39, 5  ;;  %v2432_v43 = vpop.f32.mrb[9].mxu0 }
 0x483   :  { %v1107_v44 = vadd.f32 %v1103_v41, %v2879_v21  ;;  %v1108_v45 = vadd.f32 %v1104_v42, %v2877_v19 }
 0x485   :  { %2755 = vtanh.f32 %v1107_v44 }
 0x486   :  { %2757 = vtanh.f32 %v1108_v45 }
 0x488   :  { %v999_v46 = vpop.f32.mrb[6].mxu1 }
 0x489   :  { %v2707_v47 = vadd.f32 %v2901_v26, %v999_v46  ;;  %v2421_v48 = vpop.f32.mrb[7].mxu1 }
 0x48b   :  { %2759 = vtanh.f32 %v2707_v47 }
 0x48f   :  { %v2756_v50 = vpop.eup %2755 }
 0x490   :  { %v2758_v51 = vpop.eup %2757  ;;  %v1113_v52 = vrot.slane %v2756_v50, 4 }
 0x491   :  { %v1114_v53 = vrot.slane %v2758_v51, 3 }
 0x493   :  { %v1115_v54 = vsel %vm159_vm3, %v1114_v53, %v1113_v52 }
 0x494   :  { %2442 = vmatmul.mubr.msk.f32.vlgmr.msra.gmra.mrb[10].mxu0 %vm161_vm4, %v1115_v54  ;;  %2464 = vmatmul.mubr.msk.f32.vlgmr.msra.gmra.mrb[8].mxu1 %vm161_vm4, %v1115_v54 }
 0x495   :  { %v2760_v56 = vpop.eup %2759  ;;  %2639 = vmatpush3.bf16.msra.mxu0 %v2910_v49  ;;  %2452 = vmatprep.mubr.msk.f32.mxu0 %vm2809_vm2, %v2810_v14 }
 0x496   :  { %v1012_v57 = vrot.slane %v2760_v56, %v2906_v40  ;;  %2640 = vmatprep.subr.bf16.mxu0 %v2808_v6  ;;  %2651 = vmatpush3.bf16.msra.mxu1 %v2854_v7 }
 0x497   :  { %2652 = vmatprep.subr.bf16.mxu1 %v2808_v6  ;;  %2474 = vmatprep.mubr.msk.f32.mxu1 %vm2809_vm2, %v2810_v14 }
 0x498   :  { %v1013_v58 = vcombine.high %v1012_v57, %v1012_v57  ;;  %v1020_v59 = vrot.slane %v1012_v57, %v2906_v40 }
 0x499   :  { %2642 = vmatpush3.bf16.msra.mxu0 %v2919_v55 }
 0x49a   :  { %v1027_v60 = vrot.slane %v1013_v58, %v2906_v40  ;;  %1030 = vst.msk [vmem:[#allocation2 + $0x3] sm:$0x1] %vm260_vm5, %v1020_v59  ;;  %2661 = vmatprep.subr.bf16.mxu0 %v2808_v6  ;;  %2654 = vmatpush3.bf16.msra.mxu1 %v2863_v15 }
 0x49b   :  { %2655 = vmatprep.subr.bf16.mxu1 %v2808_v6 }
 0x49c   :  { %1031 = vst.msk [vmem:[#allocation2 + $0xb] sm:$0x1] %vm260_vm5, %v1027_v60  ;;  %2453 = vmatmul.mubr.msk.f32.vlgmr.msra.gmra.mrb[10].mxu0 %vm161_vm4, %v2760_v56  ;;  %v49_v60 = vld [vmem:[#allocation3 + $0x88] sm:$0xff] }
 0x49d   :  { %2663 = vmatpush3.bf16.msra.mxu0 %v2856_v11  ;;  %2496 = vmatprep.mubr.msk.f32.mxu0 %vm2809_vm2, %v2810_v14 }
 0x49e   :  { %2664 = vmatprep.subr.bf16.mxu0 %v2808_v6 }
 0x4a1   :  { %2666 = vmatpush3.bf16.msra.mxu0 %v2867_v16 }
 0x4a2   :  { %2667 = vmatprep.subr.bf16.mxu0 %v2808_v6 }
 0x567   :  { %v1355_v61 = vpop.f32.mrb[8].mxu1 }
 0x568   :  { %v1360_v62 = vrot.slane %v1355_v61, 3  ;;  %v1361_v63 = vrot.slane %v1355_v61, 4  ;;  %v2465_v0 = vpop.f32.mrb[9].mxu1  ;;  %v50_v61 = vld [vmem:[#allocation3 + $0x90] sm:$0xff] }
 0x56a   :  { %v1364_v1 = vadd.f32 %v1360_v62, %v2879_v21  ;;  %v1365_v2 = vadd.f32 %v1361_v63, %v2877_v19  ;;  %v51_v62 = vld [vmem:[#allocation3 + $0x98] sm:$0xff] }
 0x56c   :  { %2761 = vtanh.f32 %v1364_v1 }
 0x56d   :  { %2763 = vtanh.f32 %v1365_v2 }
 0x56f   :  { %v1256_v3 = vpop.f32.mrb[10].mxu0 }
 0x570   :  { %v2708_v4 = vadd.f32 %v2901_v26, %v1256_v3  ;;  %v2454_v5 = vpop.f32.mrb[11].mxu0 }
 0x572   :  { %2765 = vtanh.f32 %v2708_v4 }
 0x576   :  { %v2762_v8 = vpop.eup %2761 }
 0x577   :  { %v2764_v9 = vpop.eup %2763  ;;  %v1370_v10 = vrot.slane %v2762_v8, 5 }
 0x578   :  { %v1371_v12 = vrot.slane %v2764_v9, 4 }
 0x57a   :  { %v1372_v13 = vsel %vm159_vm3, %v1371_v12, %v1370_v10 }
 0x57b   :  { %2475 = vmatmul.mubr.msk.f32.vlgmr.msra.gmra.mrb[10].mxu1 %vm161_vm4, %v1372_v13  ;;  %2497 = vmatmul.mubr.msk.f32.vlgmr.msra.gmra.mrb[12].mxu0 %vm161_vm4, %v1372_v13 }
 0x57c   :  { %v2766_v17 = vpop.eup %2765  ;;  %2657 = vmatpush3.bf16.msra.mxu1 %v2910_v49  ;;  %2485 = vmatprep.mubr.msk.f32.mxu1 %vm2809_vm2, %v2810_v14 }
 0x57d   :  { %v1269_v18 = vrot.slane %v2766_v17, %v2906_v40  ;;  %2658 = vmatprep.subr.bf16.mxu1 %v2808_v6  ;;  %2669 = vmatpush3.bf16.msra.mxu0 %v2854_v7 }
 0x57e   :  { %2670 = vmatprep.subr.bf16.mxu0 %v2808_v6  ;;  %2507 = vmatprep.mubr.msk.f32.mxu0 %vm2809_vm2, %v2810_v14 }
 0x57f   :  { %v1270_v20 = vcombine.high %v1269_v18, %v1269_v18  ;;  %v1277_v22 = vrot.slane %v1269_v18, %v2906_v40 }
 0x580   :  { %2660 = vmatpush3.bf16.msra.mxu1 %v2919_v55 }
 0x581   :  { %v1284_v23 = vrot.slane %v1270_v20, %v2906_v40  ;;  %1287 = vst.msk [vmem:[#allocation2 + $0x4] sm:$0x1] %vm260_vm5, %v1277_v22  ;;  %2679 = vmatprep.subr.bf16.mxu1 %v2808_v6  ;;  %2672 = vmatpush3.bf16.msra.mxu0 %v2863_v15 }
 0x582   :  { %2673 = vmatprep.subr.bf16.mxu0 %v2808_v6 }
 0x583   :  { %1288 = vst.msk [vmem:[#allocation2 + $0xc] sm:$0x1] %vm260_vm5, %v1284_v23  ;;  %2486 = vmatmul.mubr.msk.f32.vlgmr.msra.gmra.mrb[10].mxu1 %vm161_vm4, %v2766_v17 }
 0x584   :  { %2681 = vmatpush3.bf16.msra.mxu1 %v2856_v11  ;;  %2529 = vmatprep.mubr.msk.f32.mxu1 %vm2809_vm2, %v2810_v14 }
 0x585   :  { %2682 = vmatprep.subr.bf16.mxu1 %v2808_v6 }
 0x588   :  { %2684 = vmatpush3.bf16.msra.mxu1 %v2867_v16 }
 0x589   :  { %2685 = vmatprep.subr.bf16.mxu1 %v2808_v6 }
 0x64e   :  { %v1612_v24 = vpop.f32.mrb[12].mxu0 }
 0x64f   :  { %v1617_v25 = vrot.slane %v1612_v24, 2  ;;  %v1618_v27 = vrot.slane %v1612_v24, 3  ;;  %v2498_v28 = vpop.f32.mrb[13].mxu0 }
 0x651   :  { %v1621_v29 = vadd.f32 %v1617_v25, %v2879_v21  ;;  %v1622_v30 = vadd.f32 %v1618_v27, %v2877_v19 }
 0x653   :  { %2767 = vtanh.f32 %v1621_v29 }
 0x654   :  { %2769 = vtanh.f32 %v1622_v30 }
 0x656   :  { %v1513_v11 = vpop.f32.mrb[10].mxu1 }
 0x657   :  { %v2709_v31 = vadd.f32 %v2901_v26, %v1513_v11  ;;  %v2487_v32 = vpop.f32.mrb[11].mxu1 }
 0x659   :  { %2771 = vtanh.f32 %v2709_v31 }
 0x65d   :  { %v2768_v33 = vpop.eup %2767 }
 0x65e   :  { %v2770_v34 = vpop.eup %2769  ;;  %v1627_v16 = vrot.slane %v2768_v33, 6 }
 0x65f   :  { %v1628_v35 = vrot.slane %v2770_v34, 5 }
 0x661   :  { %v1629_v36 = vsel %vm159_vm3, %v1628_v35, %v1627_v16 }
 0x662   :  { %2508 = vmatmul.mubr.msk.f32.vlgmr.msra.gmra.mrb[14].mxu0 %vm161_vm4, %v1629_v36  ;;  %2530 = vmatmul.mubr.msk.f32.vlgmr.msra.gmra.mrb[12].mxu1 %vm161_vm4, %v1629_v36 }
 0x663   :  { %v2772_v37 = vpop.eup %2771  ;;  %2675 = vmatpush3.bf16.msra.mxu0 %v2910_v49  ;;  %2518 = vmatprep.mubr.msk.f32.mxu0 %vm2809_vm2, %v2810_v14 }
 0x664   :  { %v1526_v38 = vrot.slane %v2772_v37, %v2906_v40  ;;  %2676 = vmatprep.subr.bf16.mxu0 %v2808_v6  ;;  %2687 = vmatpush3.bf16.msra.mxu1 %v2854_v7 }
 0x665   :  { %2688 = vmatprep.subr.bf16.mxu1 %v2808_v6  ;;  %2540 = vmatprep.mubr.msk.f32.mxu1 %vm2809_vm2, %v2810_v14 }
 0x666   :  { %v1527_v39 = vcombine.high %v1526_v38, %v1526_v38  ;;  %v1534_v41 = vrot.slane %v1526_v38, %v2906_v40 }
 0x667   :  { %2678 = vmatpush3.bf16.msra.mxu0 %v2919_v55 }
 0x668   :  { %v1541_v42 = vrot.slane %v1527_v39, %v2906_v40  ;;  %1544 = vst.msk [vmem:[#allocation2 + $0x5] sm:$0x1] %vm260_vm5, %v1534_v41  ;;  %2690 = vmatpush3.bf16.msra.mxu1 %v2863_v15 }
 0x669   :  { %2691 = vmatprep.subr.bf16.mxu1 %v2808_v6 }
 0x66a   :  { %1545 = vst.msk [vmem:[#allocation2 + $0xd] sm:$0x1] %vm260_vm5, %v1541_v42  ;;  %2519 = vmatmul.mubr.msk.f32.vlgmr.msra.gmra.mrb[14].mxu0 %vm161_vm4, %v2772_v37 }
 0x735   :  { %v1869_v7 = vpop.f32.mrb[12].mxu1 }
 0x736   :  { %v1874_v43 = vrot.slane %v1869_v7, 1  ;;  %v1875_v44 = vrot.slane %v1869_v7, 2  ;;  %v2531_v45 = vpop.f32.mrb[13].mxu1 }
 0x738   :  { %v1878_v46 = vadd.f32 %v1874_v43, %v2879_v21  ;;  %v1879_v47 = vadd.f32 %v1875_v44, %v2877_v19 }
 0x73a   :  { %2773 = vtanh.f32 %v1878_v46 }
 0x73b   :  { %2775 = vtanh.f32 %v1879_v47 }
 0x73d   :  { %v1770_v48 = vpop.f32.mrb[14].mxu0 }
 0x73e   :  { %v2710_v50 = vadd.f32 %v2901_v26, %v1770_v48  ;;  %v2520_v15 = vpop.f32.mrb[15].mxu0 }
 0x740   :  { %2777 = vtanh.f32 %v2710_v50 }
 0x744   :  { %v2774_v51 = vpop.eup %2773 }
 0x745   :  { %v2776_v52 = vpop.eup %2775  ;;  %v1884_v53 = vrot.slane %v2774_v51, 7 }
 0x746   :  { %v1885_v54 = vrot.slane %v2776_v52, 6 }
 0x748   :  { %v1886_v56 = vsel %vm159_vm3, %v1885_v54, %v1884_v53 }
 0x749   :  { %2541 = vmatmul.mubr.msk.f32.vlgmr.msra.gmra.mrb[14].mxu1 %vm161_vm4, %v1886_v56 }
 0x74a   :  { %v2778_v57 = vpop.eup %2777  ;;  %2693 = vmatpush3.bf16.msra.mxu1 %v2910_v49  ;;  %2551 = vmatprep.mubr.msk.f32.mxu1 %vm2809_vm2, %v2810_v14  ;;  %v48_v49 = vld [vmem:[#allocation3 + $0x80] sm:$0xff] }
 0x74b   :  { %v1783_v19 = vrot.slane %v2778_v57, %v2906_v40  ;;  %2694 = vmatprep.subr.bf16.mxu1 %v2808_v6  ;;  %v2697_v14 = vpack.c.bf16 %v49_v60, %v48_v49  ;;  %v2701_v6 = vpack.c.bf16 %v51_v62, %v50_v61 }
 0x74d   :  { %v1784_v21 = vcombine.high %v1783_v19, %v1783_v19  ;;  %v1791_v58 = vrot.slane %v1783_v19, %v2906_v40  ;;  %2698 = vmatprep.subr.bf16.mxu0 %v2697_v14 }
 0x74e   :  { %2696 = vmatpush3.bf16.msra.mxu1 %v2919_v55  ;;  %2700 = vmatpush3.bf16.msra.mxu0 %v2697_v14 }
 0x74f   :  { %v1798_v59 = vrot.slane %v1784_v21, %v2906_v40  ;;  %1801 = vst.msk [vmem:[#allocation2 + $0x6] sm:$0x1] %vm260_vm5, %v1791_v58  ;;  %2702 = vmatprep.subr.bf16.mxu0 %v2701_v6 }
 0x751   :  { %1802 = vst.msk [vmem:[#allocation2 + $0xe] sm:$0x1] %vm260_vm5, %v1798_v59  ;;  %2552 = vmatmul.mubr.msk.f32.vlgmr.msra.gmra.mrb[14].mxu1 %vm161_vm4, %v2778_v57 }
 0x752   :  { %2704 = vmatpush3.bf16.msra.mxu0 %v2701_v6 }
 0x824   :  { %v2027_v63 = vpop.f32.mrb[14].mxu1 }
 0x825   :  { %v2711_v55 = vadd.f32 %v2901_v26, %v2027_v63  ;;  %v2553_v0 = vpop.f32.mrb[15].mxu1  ;;  %v2185_v26 = vld [vmem:[%s3119_s2 + $0x2] ss:$0 sm:$0xff] }
 0x827   :  { %2779 = vtanh.f32 %v2711_v55 }
 0x831   :  { %v2780_v1 = vpop.eup %2779 }
 0x832   :  { %v2040_v2 = vrot.slane %v2780_v1, %v2906_v40 }
 0x834   :  { %v2041_v3 = vcombine.high %v2040_v2, %v2040_v2  ;;  %v2048_v4 = vrot.slane %v2040_v2, %v2906_v40 }
 0x836   :  { %v2055_v5 = vrot.slane %v2041_v3, %v2906_v40  ;;  %2058 = vst.msk [vmem:[#allocation2 + $0x7] sm:$0x1] %vm260_vm5, %v2048_v4 }
 0x838   :  { %2059 = vst.msk [vmem:[#allocation2 + $0xf] sm:$0x1] %vm260_vm5, %v2055_v5 }
 0x83d   :  { %v2060_v8 = vld [vmem:[#allocation2] sm:$0xff] }
 0x83e   :  { %2562 = vmatprep.mubr.msk.f32.mxu0 %vm161_vm4, %v2060_v8 }
 0x83f   :  { %v2061_v9 = vld [vmem:[#allocation2 + $0x8] sm:$0xff] }
 0x840   :  { %2563 = vmatmul.mubr.msk.f32.vlgmr.msra.gmra.mrb[16].mxu0 %vm161_vm4, %v2061_v9 }
 0x913   :  { %v2564_v10 = vpop.f32.mrb[16].mxu0 }
 0x914   :  { %v2146_v12 = vadd.f32 %v2564_v10, %v2185_v26  ;;  %v2140_v13 = vpop.f32.mrb[17].mxu0 }
 0x915   :  { %v2141_v17 = vadd.f32 %v2185_v26, %v2140_v13 }
 0x916   :  { %2150 = vst.msk [vmem:[%s3120_s3 + $0x8] sm:$0xff] %vm62_vm1, %v2146_v12 }
 0x917   :  { %2149 = vst.msk [vmem:[%s3120_s3] sm:$0xff] %vm62_vm1, %v2141_v17 }
 0x918   :  { %2155 = vsyncpa [#allocation4], 1 }

</bundles_post_ra>
